<compile_context>
chip_gen: v5e
topology: v5e:2x2
jax: 0.10.0
libtpu: 0.0.40
codegen_flags: <defaults>
</compile_context>

<pallas_src>
import functools

import jax
import jax.numpy as jnp
from jax.experimental import pallas as pl
from jax.experimental.pallas import tpu as pltpu

_PAD = 8  # sublane-aligned zero-pad rows on each side of the staged stats columns


# ----------------------------------------------------------------------------
# Pallas kernel: per-channel stats -> 5-tap channel conv -> gate -> modulate
# ----------------------------------------------------------------------------
def _srm_kernel(w_ref, x_ref, o_ref, mstat_ref, sstat_ref, *, hw, eps):
    """One batch element.

    w_ref     : (5, 3) f32 in SMEM (the nn.Conv2d(1, 1, (5, 3)) weight)
    x_ref     : (1, C, HW) input block in VMEM
    o_ref     : (1, C, HW) output block in VMEM
    mstat_ref : (C + 2*_PAD, 1) f32 VMEM scratch (zero-padded mean column)
    sstat_ref : (C + 2*_PAD, 1) f32 VMEM scratch (zero-padded std column)
    """
    C = o_ref.shape[1]
    xv = x_ref[0].astype(jnp.float32)                      # (C, HW)

    # --- per-channel mean / unbiased std in a single pass --------------------
    s1 = jnp.sum(xv, axis=-1, keepdims=True)               # (C, 1)
    s2 = jnp.sum(xv * xv, axis=-1, keepdims=True)          # (C, 1)
    mean = s1 * (1.0 / hw)
    # torch.var(dim=2, unbiased=True) + eps, then sqrt -- matches SRMLayer.
    var = jnp.maximum(s2 - s1 * mean, 0.0) * (1.0 / (hw - 1)) + eps
    std = jnp.sqrt(var)

    # --- stage zero-padded stats in VMEM (aligned store, shifted loads) ------
    mstat_ref[...] = jnp.zeros_like(mstat_ref)
    sstat_ref[...] = jnp.zeros_like(sstat_ref)
    mstat_ref[pl.ds(_PAD, C)] = mean
    sstat_ref[pl.ds(_PAD, C)] = std

    # --- kernel_size=(5,3), stride=(1,3), padding=(2,1) conv over channels ---
    # The single output column of the width-3 window covers [pad, mean, std],
    # so conv column 0 multiplies the zero pad and channel_center is never read:
    #   y[c] = sum_k w[k,1]*mean[c-2+k] + w[k,2]*std[c-2+k]   (zero pad at ends)
    y = jnp.zeros((C, 1), jnp.float32)
    for k in range(5):                                     # 10 shifted loads + VPU madds
        y = y + (w_ref[k, 1] * mstat_ref[pl.ds(_PAD - 2 + k, C)]
                 + w_ref[k, 2] * sstat_ref[pl.ds(_PAD - 2 + k, C)])

    gate = 1.0 + jax.nn.sigmoid(y)                         # (C, 1)
    o_ref[0] = (xv * gate).astype(o_ref.dtype)             # lane-dense when HW % 128 == 0


@functools.partial(jax.jit, static_argnames=("eps",))
def srm_layer(x, conv_w, eps=1e-05):
    """Pallas SRMLayer.forward: x (N, C, H, W), conv_w (1, 1, 5, 3) -> (N, C, H, W)."""
    N, C, H, W = x.shape
    HW = H * W
    xf = x.reshape(N, C, HW)                               # free (contiguous) reshape
    wk = conv_w.reshape(5, 3).astype(jnp.float32)          # 15 scalars -> SMEM

    out = pl.pallas_call(
        functools.partial(_srm_kernel, hw=HW, eps=float(eps)),
        out_shape=jax.ShapeDtypeStruct((N, C, HW), x.dtype),
        grid_spec=pltpu.PrefetchScalarGridSpec(
            num_scalar_prefetch=1,                         # conv weights land in SMEM
            grid=(N,),
            in_specs=[pl.BlockSpec((1, C, HW), lambda n, w: (n, 0, 0))],
            out_specs=pl.BlockSpec((1, C, HW), lambda n, w: (n, 0, 0)),
            scratch_shapes=[
                pltpu.VMEM((C + 2 * _PAD, 1), jnp.float32),
                pltpu.VMEM((C + 2 * _PAD, 1), jnp.float32),
            ],
        ),
        compiler_params=pltpu.CompilerParams(dimension_semantics=("parallel",)),
    )(wk, xf)
    return out.reshape(N, C, H, W)


# ----------------------------------------------------------------------------
# Pure-JAX reference (mirrors the PyTorch module line by line)
# ----------------------------------------------------------------------------
def srm_reference(x, conv_w, eps=1e-05):
    N, C, H, W = x.shape
    xf = x.reshape(N, C, H * W).astype(jnp.float32)
    center = xf[:, :, (H * W - 1) // 2][..., None]         # unused by the conv window
    mean = xf.mean(axis=2, keepdims=True)
    var = xf.var(axis=2, keepdims=True, ddof=1) + eps
    std = jnp.sqrt(var)
    t = jnp.concatenate([mean, std, center], axis=2)       # (N, C, 3)
    tp = jnp.pad(t, ((0, 0), (2, 2), (1, 1)))              # conv padding (2, 1)
    wk = conv_w.reshape(5, 3)
    y = jnp.zeros((N, C), jnp.float32)
    for kh in range(5):                                    # stride 3 -> single out column
        for kw in range(3):
            y = y + wk[kh, kw] * tp[:, kh:kh + C, kw]
    gate = 1.0 + jax.nn.sigmoid(y)[:, :, None, None]
    return x * gate


if __name__ == "__main__":
    key = jax.random.PRNGKey(0)
    kx, kw, kx2 = jax.random.split(key, 3)
    conv_w = 0.5 * jax.random.normal(kw, (1, 1, 5, 3), jnp.float32)

    # Lane/sublane-aligned demo shape: C=64 (multiple of 8), H*W=256 (multiple of 128)
    # -> all kernel stores are unmasked, lane-dense.
    x = jax.random.normal(kx, (2, 64, 16, 16), jnp.float32)
    out = srm_layer(x, conv_w)
    jax.block_until_ready(out)
    ref = srm_reference(x, conv_w)
    assert out.shape == x.shape, out.shape
    assert bool(jnp.all(jnp.isfinite(out)))
    assert bool(jnp.allclose(out, ref, rtol=1e-4, atol=1e-4)), \
        float(jnp.max(jnp.abs(out - ref)))

    # Unaligned shape matching the CMFSL usage (100 spectral bands, 9x9 patch).
    x2 = jax.random.normal(kx2, (2, 100, 9, 9), jnp.float32)
    out2 = srm_layer(x2, conv_w)
    jax.block_until_ready(out2)
    ref2 = srm_reference(x2, conv_w)
    assert bool(jnp.all(jnp.isfinite(out2)))
    assert bool(jnp.allclose(out2, ref2, rtol=1e-4, atol=1e-4)), \
        float(jnp.max(jnp.abs(out2 - ref2)))

    print("KERNEL_OK")
</pallas_src>

<mosaic_0001>
module attributes {stable_mosaic.version = 11 : i64} {
  func.func @_srm_kernel(%arg0: i32, %arg1: memref<5x3xf32, #tpu.memory_space<smem>>, %arg2: memref<1x64x256xf32, #tpu.memory_space<vmem>>, %arg3: memref<1x64x256xf32, #tpu.memory_space<vmem>>, %arg4: memref<80x1xf32, #tpu.memory_space<vmem>>, %arg5: memref<80x1xf32, #tpu.memory_space<vmem>>) attributes {dimension_semantics = [#tpu.dimension_semantics<parallel>], iteration_bounds = array<i64: 2>, scalar_prefetch = 1 : i64, scratch_operands = 2 : i64, tpu.core_type = #tpu.core_type<tc>, window_params = [{transform_indices = @transform_0, window_bounds = array<i64: 1, 64, 256>}, {transform_indices = @transform_1, window_bounds = array<i64: 1, 64, 256>}]} {
    %c0 = arith.constant 0 : index
    %c0_0 = arith.constant 0 : index
    %c0_1 = arith.constant 0 : index
    %0 = vector.load %arg2[%c0, %c0_0, %c0_1] : memref<1x64x256xf32, #tpu.memory_space<vmem>>, vector<1x64x256xf32>
    %1 = vector.shape_cast %0 : vector<1x64x256xf32> to vector<64x256xf32>
    %cst = arith.constant dense<0.000000e+00> : vector<64xf32>
    %2 = vector.multi_reduction <add>, %1, %cst [1] : vector<64x256xf32> to vector<64xf32>
    %3 = vector.shape_cast %2 : vector<64xf32> to vector<64x1xf32>
    %4 = arith.mulf %1, %1 : vector<64x256xf32>
    %cst_2 = arith.constant dense<0.000000e+00> : vector<64xf32>
    %5 = vector.multi_reduction <add>, %4, %cst_2 [1] : vector<64x256xf32> to vector<64xf32>
    %6 = vector.shape_cast %5 : vector<64xf32> to vector<64x1xf32>
    %cst_3 = arith.constant 3.906250e-03 : f32
    %7 = vector.broadcast %cst_3 : f32 to vector<64x1xf32>
    %8 = arith.mulf %3, %7 : vector<64x1xf32>
    %9 = arith.mulf %3, %8 : vector<64x1xf32>
    %10 = arith.subf %6, %9 : vector<64x1xf32>
    %cst_4 = arith.constant 0.000000e+00 : f32
    %11 = vector.broadcast %cst_4 : f32 to vector<64x1xf32>
    %12 = arith.maximumf %10, %11 : vector<64x1xf32>
    %cst_5 = arith.constant 0.00392156886 : f32
    %13 = vector.broadcast %cst_5 : f32 to vector<64x1xf32>
    %14 = arith.mulf %12, %13 : vector<64x1xf32>
    %cst_6 = arith.constant 9.99999974E-6 : f32
    %15 = vector.broadcast %cst_6 : f32 to vector<64x1xf32>
    %16 = arith.addf %14, %15 : vector<64x1xf32>
    %17 = math.sqrt %16 : vector<64x1xf32>
    %cst_7 = arith.constant 0.000000e+00 : f32
    %18 = vector.broadcast %cst_7 : f32 to vector<80x1xf32>
    %c0_8 = arith.constant 0 : index
    %c0_9 = arith.constant 0 : index
    %19 = vector.load %arg4[%c0_8, %c0_9] : memref<80x1xf32, #tpu.memory_space<vmem>>, vector<80x1xf32>
    tpu.vector_store %arg4[%c0_8, %c0_9], %18 {strides = array<i32>} : memref<80x1xf32, #tpu.memory_space<vmem>>, vector<80x1xf32>,
    %cst_10 = arith.constant 0.000000e+00 : f32
    %20 = vector.broadcast %cst_10 : f32 to vector<80x1xf32>
    %c0_11 = arith.constant 0 : index
    %c0_12 = arith.constant 0 : index
    %21 = vector.load %arg5[%c0_11, %c0_12] : memref<80x1xf32, #tpu.memory_space<vmem>>, vector<80x1xf32>
    tpu.vector_store %arg5[%c0_11, %c0_12], %20 {strides = array<i32>} : memref<80x1xf32, #tpu.memory_space<vmem>>, vector<80x1xf32>,
    %c8 = arith.constant 8 : index
    %c0_13 = arith.constant 0 : index
    %22 = vector.load %arg4[%c8, %c0_13] : memref<80x1xf32, #tpu.memory_space<vmem>>, vector<64x1xf32>
    tpu.vector_store %arg4[%c8, %c0_13], %8 {strides = array<i32>} : memref<80x1xf32, #tpu.memory_space<vmem>>, vector<64x1xf32>,
    %c8_14 = arith.constant 8 : index
    %c0_15 = arith.constant 0 : index
    %23 = vector.load %arg5[%c8_14, %c0_15] : memref<80x1xf32, #tpu.memory_space<vmem>>, vector<64x1xf32>
    tpu.vector_store %arg5[%c8_14, %c0_15], %17 {strides = array<i32>} : memref<80x1xf32, #tpu.memory_space<vmem>>, vector<64x1xf32>,
    %cst_16 = arith.constant 0.000000e+00 : f32
    %24 = vector.broadcast %cst_16 : f32 to vector<64x1xf32>
    %c0_17 = arith.constant 0 : index
    %c1 = arith.constant 1 : index
    %25 = memref.load %arg1[%c0_17, %c1] : memref<5x3xf32, #tpu.memory_space<smem>>
    %c6 = arith.constant 6 : index
    %c0_18 = arith.constant 0 : index
    %26 = vector.load %arg4[%c6, %c0_18] : memref<80x1xf32, #tpu.memory_space<vmem>>, vector<64x1xf32>
    %27 = vector.broadcast %25 : f32 to vector<64x1xf32>
    %28 = arith.mulf %27, %26 : vector<64x1xf32>
    %c0_19 = arith.constant 0 : index
    %c2 = arith.constant 2 : index
    %29 = memref.load %arg1[%c0_19, %c2] : memref<5x3xf32, #tpu.memory_space<smem>>
    %c6_20 = arith.constant 6 : index
    %c0_21 = arith.constant 0 : index
    %30 = vector.load %arg5[%c6_20, %c0_21] : memref<80x1xf32, #tpu.memory_space<vmem>>, vector<64x1xf32>
    %31 = vector.broadcast %29 : f32 to vector<64x1xf32>
    %32 = arith.mulf %31, %30 : vector<64x1xf32>
    %33 = arith.addf %28, %32 : vector<64x1xf32>
    %34 = arith.addf %24, %33 : vector<64x1xf32>
    %c1_22 = arith.constant 1 : index
    %c1_23 = arith.constant 1 : index
    %35 = memref.load %arg1[%c1_22, %c1_23] : memref<5x3xf32, #tpu.memory_space<smem>>
    %c7 = arith.constant 7 : index
    %c0_24 = arith.constant 0 : index
    %36 = vector.load %arg4[%c7, %c0_24] : memref<80x1xf32, #tpu.memory_space<vmem>>, vector<64x1xf32>
    %37 = vector.broadcast %35 : f32 to vector<64x1xf32>
    %38 = arith.mulf %37, %36 : vector<64x1xf32>
    %c1_25 = arith.constant 1 : index
    %c2_26 = arith.constant 2 : index
    %39 = memref.load %arg1[%c1_25, %c2_26] : memref<5x3xf32, #tpu.memory_space<smem>>
    %c7_27 = arith.constant 7 : index
    %c0_28 = arith.constant 0 : index
    %40 = vector.load %arg5[%c7_27, %c0_28] : memref<80x1xf32, #tpu.memory_space<vmem>>, vector<64x1xf32>
    %41 = vector.broadcast %39 : f32 to vector<64x1xf32>
    %42 = arith.mulf %41, %40 : vector<64x1xf32>
    %43 = arith.addf %38, %42 : vector<64x1xf32>
    %44 = arith.addf %34, %43 : vector<64x1xf32>
    %c2_29 = arith.constant 2 : index
    %c1_30 = arith.constant 1 : index
    %45 = memref.load %arg1[%c2_29, %c1_30] : memref<5x3xf32, #tpu.memory_space<smem>>
    %c8_31 = arith.constant 8 : index
    %c0_32 = arith.constant 0 : index
    %46 = vector.load %arg4[%c8_31, %c0_32] : memref<80x1xf32, #tpu.memory_space<vmem>>, vector<64x1xf32>
    %47 = vector.broadcast %45 : f32 to vector<64x1xf32>
    %48 = arith.mulf %47, %46 : vector<64x1xf32>
    %c2_33 = arith.constant 2 : index
    %c2_34 = arith.constant 2 : index
    %49 = memref.load %arg1[%c2_33, %c2_34] : memref<5x3xf32, #tpu.memory_space<smem>>
    %c8_35 = arith.constant 8 : index
    %c0_36 = arith.constant 0 : index
    %50 = vector.load %arg5[%c8_35, %c0_36] : memref<80x1xf32, #tpu.memory_space<vmem>>, vector<64x1xf32>
    %51 = vector.broadcast %49 : f32 to vector<64x1xf32>
    %52 = arith.mulf %51, %50 : vector<64x1xf32>
    %53 = arith.addf %48, %52 : vector<64x1xf32>
    %54 = arith.addf %44, %53 : vector<64x1xf32>
    %c3 = arith.constant 3 : index
    %c1_37 = arith.constant 1 : index
    %55 = memref.load %arg1[%c3, %c1_37] : memref<5x3xf32, #tpu.memory_space<smem>>
    %c9 = arith.constant 9 : index
    %c0_38 = arith.constant 0 : index
    %56 = vector.load %arg4[%c9, %c0_38] : memref<80x1xf32, #tpu.memory_space<vmem>>, vector<64x1xf32>
    %57 = vector.broadcast %55 : f32 to vector<64x1xf32>
    %58 = arith.mulf %57, %56 : vector<64x1xf32>
    %c3_39 = arith.constant 3 : index
    %c2_40 = arith.constant 2 : index
    %59 = memref.load %arg1[%c3_39, %c2_40] : memref<5x3xf32, #tpu.memory_space<smem>>
    %c9_41 = arith.constant 9 : index
    %c0_42 = arith.constant 0 : index
    %60 = vector.load %arg5[%c9_41, %c0_42] : memref<80x1xf32, #tpu.memory_space<vmem>>, vector<64x1xf32>
    %61 = vector.broadcast %59 : f32 to vector<64x1xf32>
    %62 = arith.mulf %61, %60 : vector<64x1xf32>
    %63 = arith.addf %58, %62 : vector<64x1xf32>
    %64 = arith.addf %54, %63 : vector<64x1xf32>
    %c4 = arith.constant 4 : index
    %c1_43 = arith.constant 1 : index
    %65 = memref.load %arg1[%c4, %c1_43] : memref<5x3xf32, #tpu.memory_space<smem>>
    %c10 = arith.constant 10 : index
    %c0_44 = arith.constant 0 : index
    %66 = vector.load %arg4[%c10, %c0_44] : memref<80x1xf32, #tpu.memory_space<vmem>>, vector<64x1xf32>
    %67 = vector.broadcast %65 : f32 to vector<64x1xf32>
    %68 = arith.mulf %67, %66 : vector<64x1xf32>
    %c4_45 = arith.constant 4 : index
    %c2_46 = arith.constant 2 : index
    %69 = memref.load %arg1[%c4_45, %c2_46] : memref<5x3xf32, #tpu.memory_space<smem>>
    %c10_47 = arith.constant 10 : index
    %c0_48 = arith.constant 0 : index
    %70 = vector.load %arg5[%c10_47, %c0_48] : memref<80x1xf32, #tpu.memory_space<vmem>>, vector<64x1xf32>
    %71 = vector.broadcast %69 : f32 to vector<64x1xf32>
    %72 = arith.mulf %71, %70 : vector<64x1xf32>
    %73 = arith.addf %68, %72 : vector<64x1xf32>
    %74 = arith.addf %64, %73 : vector<64x1xf32>
    %75 = arith.negf %74 : vector<64x1xf32>
    %76 = math.exp %75 : vector<64x1xf32>
    %cst_49 = arith.constant 1.000000e+00 : f32
    %77 = vector.broadcast %cst_49 : f32 to vector<64x1xf32>
    %78 = arith.addf %77, %76 : vector<64x1xf32>
    %79 = arith.divf %77, %78 : vector<64x1xf32>
    %cst_50 = arith.constant 1.000000e+00 : f32
    %80 = vector.broadcast %cst_50 : f32 to vector<64x1xf32>
    %81 = arith.addf %80, %79 : vector<64x1xf32>
    %82 = vector.broadcast %81 : vector<64x1xf32> to vector<64x256xf32>
    %83 = arith.mulf %1, %82 : vector<64x256xf32>
    %c0_51 = arith.constant 0 : index
    %c0_52 = arith.constant 0 : index
    %c0_53 = arith.constant 0 : index
    %84 = vector.load %arg3[%c0_51, %c0_52, %c0_53] : memref<1x64x256xf32, #tpu.memory_space<vmem>>, vector<1x64x256xf32>
    %85 = vector.shape_cast %84 : vector<1x64x256xf32> to vector<64x256xf32>
    %86 = vector.shape_cast %83 : vector<64x256xf32> to vector<1x64x256xf32>
    tpu.vector_store %arg3[%c0_51, %c0_52, %c0_53], %86 {strides = array<i32>} : memref<1x64x256xf32, #tpu.memory_space<vmem>>, vector<1x64x256xf32>,
    return
  }
  func.func @transform_0(%arg0: i32, %arg1: memref<5x3xf32, #tpu.memory_space<smem>>) -> (i32, i32, i32) {
    %c0_i32 = arith.constant 0 : i32
    %c0_i32_0 = arith.constant 0 : i32
    %c0_i32_1 = arith.constant 0 : i32
    return %arg0, %c0_i32, %c0_i32_0 : i32, i32, i32
  }
  func.func @transform_1(%arg0: i32, %arg1: memref<5x3xf32, #tpu.memory_space<smem>>) -> (i32, i32, i32) {
    %c0_i32 = arith.constant 0 : i32
    %c0_i32_0 = arith.constant 0 : i32
    %c0_i32_1 = arith.constant 0 : i32
    return %arg0, %c0_i32, %c0_i32_0 : i32, i32, i32
  }
}

</mosaic_0001>

<bundles_post_ra>
// kernel: srm_layer.1
= control target key start
LH: loop header
LB: loop body
LE: loop exit
PB: predicated region body
PF: predicated region fallthrough
CT: control target
= control target key end

     0   :  { %s1065_s12 = smov [#allocation5]   ;;  %s1611_s0 = inlined_call_operand.vmem [shape: f32[5,3], index: 0, kind: input, shape index: {}]   ;;  %s1612_s1 = inlined_call_operand.vmem [shape: f32[2,64,256], index: 1, kind: input, shape index: {}]   ;;  %s1613_s2 = inlined_call_operand.vmem [shape: f32[2,64,256], index: 2, kind: output, shape index: {}]  }
   0x1   :  { %s8_s11 = sshll.u32 %s1611_s0, 4  ;;  %s9_s11 = int_to_ptr.vmem [resolvable:$true] %s8_s11 }
   0x2   :  { %11 = dma.vmem_to_smem %s9_s11, 128, %s1065_s12, [#allocation4] }
   0x3   :  { %1059 = dma.done.wait [#allocation4], 128 }
   0x4   :  { %1060 = vsyncadd [#allocation4], 4294967168 }
   0x5   :  { %14 = sfence }
   0x6   :  { %s1086_s13 = smov 0  }
   0x7 LB: > { %s934_s14 = sadd.s32 4294967295, %s1063_s13   ;;  %p938_p0 = scmp.ge.s32.totalorder %s1063_s13, 1  ;;  %s1063_s13 = sphi %s1086_s13, %s20_s13  }
   0x8   : > { %p96_p1 = scmp.lt.s32.totalorder %s1063_s13, 3 }
   0xa   : > { %p97_p2 = pnand %p938_p0, %p96_p1 }
   0xc   : > { %100 = sbr.rel (%p97_p2) target bundleno = 397 (0x18d), region = 24 }
  0x11   : > { %p116_p3 = scmp.lt.s32.totalorder %s934_s14, 1  ;;  %vm350_vm0 = vcmask 7168   ;;  %v1066_v24 = vmov 0.0   ;;  %s943_s18 = sld [smem:[#allocation5 + $0x1]] }
  0x12   : > { %356 = vst.msk [vmem:[#allocation2 + $0x28] sm:$0xff] %vm350_vm0, %v1066_v24  ;;  %s945_s19 = sld [smem:[#allocation5 + $0x81]] }
  0x13   : > { %s1627_s14 = smov (!%p116_p3, %s934_s14), 1  ;;  %351 = vst.msk [vmem:[#allocation2] sm:$0xff] %vm350_vm0, %v1066_v24  ;;  %s947_s20 = sld [smem:[#allocation5 + $0x101]] }
  0x14   : > { %s963_s0 = sshll.u32 %s1627_s14, 7  ;;  %352 = vst.msk [vmem:[#allocation2 + $0x8] sm:$0xff] %vm350_vm0, %v1066_v24  ;;  %s949_s21 = sld [smem:[#allocation5 + $0x181]] }
  0x15   : > { %s1102_s17 = scalar_lea.vmem %s1612_s1, %s963_s0  ;;  %353 = vst.msk [vmem:[#allocation2 + $0x10] sm:$0xff] %vm350_vm0, %v1066_v24  ;;  %s951_s22 = sld [smem:[#allocation5 + $0x201]] }
  0x16   : > { %v1105_v0 = vld [vmem:[%s1102_s17 + $0x40] sm:$0xff]  ;;  %v1108_v1 = vld [vmem:[%s1102_s17 + $0x48] sm:$0xff]  ;;  %v136_v9 = vld [vmem:[%s1102_s17 + $0x50] sm:$0xff]  ;;  %354 = vst.msk [vmem:[#allocation2 + $0x18] sm:$0xff] %vm350_vm0, %v1066_v24  ;;  %s1232_s23 = sld [smem:[#allocation5 + $0x2]]  ;;  %s1574_s30 = scalar_lea.vmem %s1613_s2, %s963_s0 }
  0x17   : > { %v130_v2 = vld [vmem:[%s1102_s17 + $0x20] sm:$0xff]  ;;  %v154_v3 = vadd.f32 %v1108_v1, %v1105_v0  ;;  %v131_v4 = vld [vmem:[%s1102_s17 + $0x28] sm:$0xff]  ;;  %v137_v10 = vld [vmem:[%s1102_s17 + $0x58] sm:$0xff]  ;;  %355 = vst.msk [vmem:[#allocation2 + $0x20] sm:$0xff] %vm350_vm0, %v1066_v24  ;;  %v174_v39 = vmul.f32 %v1105_v0, %v1105_v0  ;;  %v176_v40 = vmul.f32 %v136_v9, %v136_v9  ;;  %v175_v42 = vmul.f32 %v1108_v1, %v1108_v1  ;;  %s1244_s24 = sld [smem:[#allocation5 + $0x82]] }
  0x18   : > { %v126_v5 = vld [vmem:[%s1102_s17] sm:$0xff]  ;;  %v127_v6 = vld [vmem:[%s1102_s17 + $0x8] sm:$0xff]  ;;  %v148_v7 = vadd.f32 %v131_v4, %v130_v2  ;;  %v132_v11 = vld [vmem:[%s1102_s17 + $0x30] sm:$0xff]  ;;  %v157_v15 = vadd.f32 %v137_v10, %v136_v9  ;;  %v170_v28 = vmul.f32 %v130_v2, %v130_v2  ;;  %357 = vst.msk [vmem:[#allocation2 + $0x30] sm:$0xff] %vm350_vm0, %v1066_v24  ;;  %v171_v31 = vmul.f32 %v131_v4, %v131_v4  ;;  %s1254_s25 = sld [smem:[#allocation5 + $0x102]] }
  0x19   : > { %v142_v8 = vadd.f32 %v127_v6, %v126_v5  ;;  %155 = vadd.xlane.f32.xlu2 %v154_v3  ;;  %v133_v12 = vld [vmem:[%s1102_s17 + $0x38] sm:$0xff]  ;;  %v128_v13 = vld [vmem:[%s1102_s17 + $0x10] sm:$0xff]  ;;  %v166_v18 = vmul.f32 %v126_v5, %v126_v5  ;;  %v167_v19 = vmul.f32 %v127_v6, %v127_v6  ;;  %v138_v22 = vld [vmem:[%s1102_s17 + $0x60] sm:$0xff]  ;;  %v172_v29 = vmul.f32 %v132_v11, %v132_v11  ;;  %s1313_s26 = sld [smem:[#allocation5 + $0x182]] }
  0x1a   : > { %149 = vadd.xlane.f32.xlu1 %v148_v7  ;;  %v129_v14 = vld [vmem:[%s1102_s17 + $0x18] sm:$0xff]  ;;  %v151_v16 = vadd.f32 %v133_v12, %v132_v11  ;;  %v140_v20 = vld [vmem:[%s1102_s17 + $0x70] sm:$0xff]  ;;  %v139_v23 = vld [vmem:[%s1102_s17 + $0x68] sm:$0xff]  ;;  %v173_v30 = vmul.f32 %v133_v12, %v133_v12  ;;  %v168_v32 = vmul.f32 %v128_v13, %v128_v13  ;;  %358 = vst.msk [vmem:[#allocation2 + $0x38] sm:$0xff] %vm350_vm0, %v1066_v24  ;;  %v1158_v7 = vstv %s943_s18  ;;  %s1318_s27 = sld [smem:[#allocation5 + $0x202]] }
  0x1b   : > { %143 = vadd.xlane.f32.xlu0 %v142_v8  ;;  %v145_v17 = vadd.f32 %v129_v14, %v128_v13  ;;  %v141_v21 = vld [vmem:[%s1102_s17 + $0x78] sm:$0xff]  ;;  %v182_v25 = vadd.f32 %v167_v19, %v166_v18  ;;  %v160_v27 = vadd.f32 %v139_v23, %v138_v22  ;;  %v169_v33 = vmul.f32 %v129_v14, %v129_v14 }
  0x1c   : > { %v163_v26 = vadd.f32 %v141_v21, %v140_v20  ;;  %359 = vst.msk [vmem:[#allocation2 + $0x40] sm:$0xff] %vm350_vm0, %v1066_v24  ;;  %v191_v34 = vadd.f32 %v173_v30, %v172_v29  ;;  %v188_v35 = vadd.f32 %v171_v31, %v170_v28  ;;  %v178_v37 = vmul.f32 %v138_v22, %v138_v22 }
  0x1d   : > { %360 = vst.msk [vmem:[#allocation2 + $0x48] sm:$0xff] %vm350_vm0, %v1066_v24  ;;  %v185_v36 = vadd.f32 %v169_v33, %v168_v32  ;;  %v179_v38 = vmul.f32 %v139_v23, %v139_v23  ;;  %v177_v41 = vmul.f32 %v137_v10, %v137_v10  ;;  %v194_v45 = vadd.f32 %v175_v42, %v174_v39 }
  0x1e   : > { %361 = vst.msk [vmem:[#allocation3] sm:$0xff] %vm350_vm0, %v1066_v24  ;;  %v180_v46 = vmul.f32 %v140_v20, %v140_v20  ;;  %v181_v47 = vmul.f32 %v141_v21, %v141_v21  ;;  %v1160_v8 = vstv %s945_s19  ;;  %v1162_v9 = vstv %s947_s20 }
  0x1f   : > { %362 = vst.msk [vmem:[#allocation3 + $0x8] sm:$0xff] %vm350_vm0, %v1066_v24  ;;  %v200_v43 = vadd.f32 %v179_v38, %v178_v37  ;;  %v197_v44 = vadd.f32 %v177_v41, %v176_v40 }
  0x20   : > { %363 = vst.msk [vmem:[#allocation3 + $0x10] sm:$0xff] %vm350_vm0, %v1066_v24  ;;  %v203_v48 = vadd.f32 %v181_v47, %v180_v46 }
  0x21   : > { %158 = vadd.xlane.f32.xlu2 %v157_v15  ;;  %364 = vst.msk [vmem:[#allocation3 + $0x18] sm:$0xff] %vm350_vm0, %v1066_v24 }
  0x22   : > { %152 = vadd.xlane.f32.xlu1 %v151_v16  ;;  %365 = vst.msk [vmem:[#allocation3 + $0x20] sm:$0xff] %vm350_vm0, %v1066_v24  ;;  %v1168_v16 = vstv %s949_s21 }
  0x23   : > { %146 = vadd.xlane.f32.xlu0 %v145_v17  ;;  %366 = vst.msk [vmem:[#allocation3 + $0x28] sm:$0xff] %vm350_vm0, %v1066_v24  ;;  %v1170_v17 = vstv %s951_s22 }
  0x24   : > { %367 = vst.msk [vmem:[#allocation3 + $0x30] sm:$0xff] %vm350_vm0, %v1066_v24 }
  0x25   : > { %368 = vst.msk [vmem:[#allocation3 + $0x38] sm:$0xff] %vm350_vm0, %v1066_v24 }
  0x26   : > { %369 = vst.msk [vmem:[#allocation3 + $0x40] sm:$0xff] %vm350_vm0, %v1066_v24 }
  0x27   : > { %370 = vst.msk [vmem:[#allocation3 + $0x48] sm:$0xff] %vm350_vm0, %v1066_v24 }
  0x29   : > { %183 = vadd.xlane.f32.xlu2 %v182_v25 }
  0x2a   : > { %164 = vadd.xlane.f32.xlu1 %v163_v26 }
  0x2b   : > { %161 = vadd.xlane.f32.xlu0 %v160_v27 }
  0x31   : > { %192 = vadd.xlane.f32.xlu2 %v191_v34 }
  0x32   : > { %189 = vadd.xlane.f32.xlu1 %v188_v35 }
  0x33   : > { %186 = vadd.xlane.f32.xlu0 %v185_v36 }
  0x39   : > { %201 = vadd.xlane.f32.xlu2 %v200_v43 }
  0x3a   : > { %198 = vadd.xlane.f32.xlu1 %v197_v44 }
  0x3b   : > { %195 = vadd.xlane.f32.xlu0 %v194_v45 }
  0x43   : > { %204 = vadd.xlane.f32.xlu0 %v203_v48 }
  0x8c   : > { %v156_v49 = vpop.xlane.xlu2 %155 }
  0x8d   : > { %v210_v50 = vmul.f32 0.00390625, %v156_v49  ;;  %v150_v51 = vpop.xlane.xlu1 %149 }
  0x8e   : > { %v144_v52 = vpop.xlane.xlu0 %143  ;;  %v208_v53 = vmul.f32 0.00390625, %v150_v51 }
  0x8f   : > { %v206_v54 = vmul.f32 0.00390625, %v144_v52  ;;  %375 = vst.msk [vmem:[#allocation2 + $0x28] sm:$0xff] %vm350_vm0, %v210_v50  ;;  %v1164_v12 = vmul.f32 %v210_v50, %v156_v49 }
  0x90   : > { %373 = vst.msk [vmem:[#allocation2 + $0x18] sm:$0xff] %vm350_vm0, %v208_v53  ;;  %v216_v18 = vmul.f32 %v208_v53, %v150_v51 }
  0x91   : > { %371 = vst.msk [vmem:[#allocation2 + $0x8] sm:$0xff] %vm350_vm0, %v206_v54  ;;  %v214_v61 = vmul.f32 %v206_v54, %v144_v52 }
  0x94   : > { %v159_v55 = vpop.xlane.xlu2 %158 }
  0x95   : > { %v211_v56 = vmul.f32 0.00390625, %v159_v55  ;;  %v153_v57 = vpop.xlane.xlu1 %152 }
  0x96   : > { %v147_v58 = vpop.xlane.xlu0 %146  ;;  %v209_v59 = vmul.f32 0.00390625, %v153_v57  ;;  %v496_v11 = vld [vmem:[#allocation2 + $0x28] sm:$0xff] }
  0x97   : > { %v207_v60 = vmul.f32 0.00390625, %v147_v58  ;;  %376 = vst.msk [vmem:[#allocation2 + $0x30] sm:$0xff] %vm350_vm0, %v211_v56  ;;  %v494_v10 = vld [vmem:[#allocation2 + $0x18] sm:$0xff]  ;;  %v1172_v19 = vmul.f32 %v211_v56, %v159_v55  ;;  %v1182_v30 = vmul.f32 %v1162_v9, %v496_v11 }
  0x98   : > { %374 = vst.msk [vmem:[#allocation2 + $0x20] sm:$0xff] %vm350_vm0, %v209_v59  ;;  %v388_v6 = vld [vmem:[#allocation2 + $0x6] sm:$0xff]  ;;  %v217_v20 = vmul.f32 %v209_v59, %v153_v57  ;;  %v1179_v29 = vmul.f32 %v1162_v9, %v494_v10 }
  0x99   : > { %372 = vst.msk [vmem:[#allocation2 + $0x10] sm:$0xff] %vm350_vm0, %v207_v60  ;;  %v440_v14 = vld [vmem:[#allocation2 + $0x7] sm:$0xff]  ;;  %v215_v21 = vmul.f32 %v207_v60, %v147_v58  ;;  %v1176_v28 = vmul.f32 %v1158_v7, %v388_v6 }
  0x9a   : > { %v492_v15 = vld [vmem:[#allocation2 + $0x8] sm:$0xff]  ;;  %v1185_v34 = vmul.f32 %v1160_v8, %v440_v14 }
  0x9b   : > { %v1188_v38 = vmul.f32 %v1162_v9, %v492_v15 }
  0x9c   : > { %v184_v62 = vpop.xlane.xlu2 %183 }
  0x9d   : > { %v165_v63 = vpop.xlane.xlu1 %164  ;;  %v222_v0 = vsub.f32 %v184_v62, %v214_v61 }
  0x9e   : > { %v162_v1 = vpop.xlane.xlu0 %161  ;;  %v213_v2 = vmul.f32 0.00390625, %v165_v63  ;;  %v548_v23 = vld [vmem:[#allocation2 + $0x29] sm:$0xff] }
  0x9f   : > { %v212_v3 = vmul.f32 0.00390625, %v162_v1  ;;  %v230_v4 = vmax.f32 %v222_v0, 0.0  ;;  %v600_v24 = vld [vmem:[#allocation2 + $0x2a] sm:$0xff]  ;;  %v546_v36 = vld [vmem:[#allocation2 + $0x19] sm:$0xff]  ;;  %v1191_v41 = vmul.f32 %v1168_v16, %v548_v23  ;;  %v547_v6 = vld [vmem:[#allocation2 + $0x21] sm:$0xff] }
  0xa0   : > { %378 = vst.msk [vmem:[#allocation2 + $0x40] sm:$0xff] %vm350_vm0, %v213_v2  ;;  %v393_v25 = vld [vmem:[#allocation2 + $0x2e] sm:$0xff]  ;;  %v598_v37 = vld [vmem:[#allocation2 + $0x1a] sm:$0xff]  ;;  %v1194_v42 = vmul.f32 %v1170_v17, %v600_v24  ;;  %v1199_v44 = vmul.f32 %v213_v2, %v165_v63  ;;  %v1205_v54 = vmul.f32 %v1168_v16, %v546_v36  ;;  %v1260_v36 = vmul.f32 %v1168_v16, %v547_v6 }
  0xa1   : > { %v238_v5 = vmul.f32 0.003921569, %v230_v4  ;;  %377 = vst.msk [vmem:[#allocation2 + $0x38] sm:$0xff] %vm350_vm0, %v212_v3  ;;  %v544_v35 = vld [vmem:[#allocation2 + $0x9] sm:$0xff]  ;;  %v390_v40 = vld [vmem:[#allocation2 + $0x16] sm:$0xff]  ;;  %v1197_v43 = vmul.f32 %v1158_v7, %v393_v25  ;;  %v391_v51 = vld [vmem:[#allocation2 + $0x1e] sm:$0xff]  ;;  %v220_v52 = vmul.f32 %v212_v3, %v162_v1  ;;  %v1208_v55 = vmul.f32 %v1170_v17, %v598_v37 }
  0xa2   : > { %v596_v39 = vld [vmem:[#allocation2 + $0xa] sm:$0xff]  ;;  %v442_v48 = vld [vmem:[#allocation2 + $0x17] sm:$0xff]  ;;  %v1202_v53 = vmul.f32 %v1168_v16, %v544_v35  ;;  %v1214_v0 = vmul.f32 %v1158_v7, %v390_v40  ;;  %v443_v4 = vld [vmem:[#allocation2 + $0x1f] sm:$0xff]  ;;  %v1241_v24 = vmul.f32 %v1158_v7, %v391_v51 }
  0xa3   : > { %v1166_v13 = vadd.f32 1e-05, %v238_v5  ;;  %v389_v49 = vld [vmem:[#allocation2 + $0xe] sm:$0xff]  ;;  %v1211_v62 = vmul.f32 %v1170_v17, %v596_v39  ;;  %v1217_v1 = vmul.f32 %v1160_v8, %v442_v48  ;;  %v495_v5 = vld [vmem:[#allocation2 + $0x20] sm:$0xff] }
  0xa4   : > { %v193_v22 = vpop.xlane.xlu2 %192  ;;  %v441_v50 = vld [vmem:[#allocation2 + $0xf] sm:$0xff]  ;;  %v1220_v2 = vmul.f32 %v1158_v7, %v389_v49  ;;  %v1257_v35 = vmul.f32 %v1162_v9, %v495_v5  ;;  %v444_v37 = vld [vmem:[#allocation2 + $0x27] sm:$0xff] }
  0xa5   : > { %979 = vrsqrt.f32 %v1166_v13  ;;  %v190_v26 = vpop.xlane.xlu1 %189  ;;  %v225_v32 = vsub.f32 %v193_v22, %v217_v20  ;;  %v493_v56 = vld [vmem:[#allocation2 + $0x10] sm:$0xff]  ;;  %v1223_v3 = vmul.f32 %v1160_v8, %v441_v50  ;;  %vm261_vm1 = vcmp.eq.f32.partialorder %v1166_v13, inf }
  0xa6   : > { %v187_v27 = vpop.xlane.xlu0 %186  ;;  %v224_v31 = vsub.f32 %v190_v26, %v216_v18  ;;  %v545_v57 = vld [vmem:[#allocation2 + $0x11] sm:$0xff]  ;;  %v1235_v22 = vmul.f32 %v1162_v9, %v493_v56  ;;  %vm263_vm2 = vcmp.eq.f32.partialorder %v1166_v13, 0.0 }
  0xa7   : > { %v223_v33 = vsub.f32 %v187_v27, %v215_v21  ;;  %v233_v46 = vmax.f32 %v225_v32, 0.0  ;;  %v597_v58 = vld [vmem:[#allocation2 + $0x12] sm:$0xff]  ;;  %v1238_v23 = vmul.f32 %v1168_v16, %v545_v57  ;;  %v599_v32 = vld [vmem:[#allocation2 + $0x22] sm:$0xff] }
  0xa8   : > { %v232_v45 = vmax.f32 %v224_v31, 0.0  ;;  %v1247_v27 = vmul.f32 %v1170_v17, %v597_v58  ;;  %v1250_v31 = vmul.f32 %v1160_v8, %v443_v4  ;;  %v445_v39 = vld [vmem:[#allocation2 + $0x2f] sm:$0xff]  ;;  %v1267_v50 = vmul.f32 %v1170_v17, %v599_v32 }
  0xa9   : > { %v231_v47 = vmax.f32 %v223_v33, 0.0  ;;  %v241_v60 = vmul.f32 0.003921569, %v233_v46  ;;  %v392_v33 = vld [vmem:[#allocation2 + $0x26] sm:$0xff]  ;;  %v497_v46 = vld [vmem:[#allocation2 + $0x30] sm:$0xff] }
  0xaa   : > { %v240_v59 = vmul.f32 0.003921569, %v232_v45  ;;  %v264_v45 = vand.u32 2147483648, %v1166_v13  ;;  %v1270_v51 = vmul.f32 %v1158_v7, %v392_v33  ;;  %v601_v56 = vld [vmem:[#allocation2 + $0x32] sm:$0xff]  ;;  %v1280_v4 = vmul.f32 %v1162_v9, %v497_v46 }
  0xab   : > { %v239_v61 = vmul.f32 0.003921569, %v231_v47  ;;  %v980_v63 = vpop.eup %979  ;;  %v1228_v14 = vadd.f32 1e-05, %v241_v60  ;;  %v499_v47 = vld [vmem:[#allocation2 + $0x40] sm:$0xff]  ;;  %v1277_v60 = vmul.f32 %v1160_v8, %v445_v39 }
  0xac   : > { %v255_v10 = vmul.f32 %v980_v63, %v1166_v13  ;;  %v1226_v11 = vadd.f32 1e-05, %v240_v59  ;;  %v202_v18 = vpop.xlane.xlu2 %201  ;;  %v1274_v59 = vmul.f32 %v1160_v8, %v444_v37  ;;  %1614 = vst [vmem:[#allocation7_spill] sm:$0xff] %v1280_v4  ;;  %v1283_v5 = vmul.f32 %v1162_v9, %v499_v47 }
  0xad   : > { %v1230_v15 = vadd.f32 1e-05, %v239_v61  ;;  %v228_v20 = vsub.f32 %v202_v18, %v220_v52  ;;  %v199_v26 = vpop.xlane.xlu1 %198  ;;  %v549_v52 = vld [vmem:[#allocation2 + $0x31] sm:$0xff]  ;;  %v1295_v37 = vstv %s1232_s23  ;;  %v1300_v47 = vstv %s1244_s24 }
  0xae   : > { %v196_v21 = vpop.xlane.xlu0 %195  ;;  %v256_v25 = vmul.f32 %v980_v63, %v255_v10  ;;  %981 = vrsqrt.f32 %v1226_v11  ;;  %v227_v48 = vsub.f32 %v199_v26, %v1172_v19  ;;  %1615 = vst [vmem:[#allocation8_spill] sm:$0xff] %v1283_v5  ;;  %vm285_vm3 = vcmp.eq.f32.partialorder %v1226_v11, inf }
  0xaf   : > { %983 = vrsqrt.f32 %v1228_v14  ;;  %v236_v49 = vmax.f32 %v228_v20, 0.0  ;;  %v226_v58 = vsub.f32 %v196_v21, %v1164_v12  ;;  %v1286_v12 = vmul.f32 %v1168_v16, %v549_v52 }
  0xb0   : > { %v257_v40 = vmul.f32 0.5, %v256_v25  ;;  %985 = vrsqrt.f32 %v1230_v15  ;;  %v235_v19 = vmax.f32 %v227_v48, 0.0  ;;  %v1289_v20 = vmul.f32 %v1170_v17, %v601_v56 }
  0xb1   : > { %v244_v61 = vmul.f32 0.003921569, %v236_v49  ;;  %v234_v18 = vmax.f32 %v226_v58, 0.0  ;;  %1616 = vst [vmem:[#allocation9_spill] sm:$0xff] %v1286_v12  ;;  %vm287_vm4 = vcmp.eq.f32.partialorder %v1226_v11, 0.0  ;;  %vm297_vm5 = vcmp.eq.f32.partialorder %v1228_v14, inf }
  0xb2   : > { %v258_v57 = vsub.f32 1.5, %v257_v40  ;;  %1617 = vst [vmem:[#allocation10_spill] sm:$0xff] %v1289_v20  ;;  %v243_v26 = vmul.f32 0.003921569, %v235_v19  ;;  %v1311_v19 = vstv %s1254_s25  ;;  %vm299_vm6 = vcmp.eq.f32.partialorder %v1228_v14, 0.0 }
  0xb3   : > { %v1292_v32 = vadd.f32 1e-05, %v244_v61  ;;  %v242_v46 = vmul.f32 0.003921569, %v234_v18  ;;  %vm273_vm7 = vcmp.eq.f32.partialorder %v1230_v15, inf  ;;  %vm275_vm8 = vcmp.eq.f32.partialorder %v1230_v15, 0.0 }
  0xb4   : > { %v982_v6 = vpop.eup %981  ;;  %v259_v10 = vmul.f32 %v980_v63, %v258_v57  ;;  %v1303_v52 = vadd.f32 1e-05, %v243_v26 }
  0xb5   : > { %v984_v21 = vpop.eup %983  ;;  %v279_v25 = vmul.f32 %v982_v6, %v1226_v11  ;;  %987 = vrsqrt.f32 %v1292_v32  ;;  %vm333_vm9 = vcmp.eq.f32.partialorder %v1292_v32, inf  ;;  %vm335_vm11 = vcmp.eq.f32.partialorder %v1292_v32, 0.0 }
  0xb6   : > { %v205_v33 = vpop.xlane.xlu0 %204  ;;  %v986_v39 = vpop.eup %985  ;;  %v260_v63 = vmul.f32 %v259_v10, %v1166_v13  ;;  %v291_v40 = vmul.f32 %v984_v21, %v1228_v14  ;;  %989 = vrsqrt.f32 %v1303_v52  ;;  %vm321_vm10 = vcmp.eq.f32.partialorder %v1303_v52, inf }
  0xb7   : > { %v280_v48 = vmul.f32 %v982_v6, %v279_v25  ;;  %v267_v49 = vmul.f32 %v986_v39, %v1230_v15  ;;  %v229_v58 = vsub.f32 %v205_v33, %v1199_v44  ;;  %v288_v44 = vand.u32 2147483648, %v1226_v11 }
  0xb8   : > { %v262_v56 = vsel %vm261_vm1, %v1166_v13, %v260_v63  ;;  %v292_v57 = vmul.f32 %v984_v21, %v291_v40  ;;  %vm323_vm12 = vcmp.eq.f32.partialorder %v1303_v52, 0.0 }
  0xb9   : > { %v265_v61 = vsel %vm263_vm2, %v264_v45, %v262_v56  ;;  %v281_v10 = vmul.f32 0.5, %v280_v48  ;;  %v268_v18 = vmul.f32 %v986_v39, %v267_v49  ;;  %v1325_v45 = vadd.f32 1e-05, %v242_v46 }
  0xba   : > { %379 = vst.msk [vmem:[#allocation3 + $0x8] sm:$0xff] %vm350_vm0, %v265_v61  ;;  %v293_v25 = vmul.f32 0.5, %v292_v57  ;;  %v237_v63 = vmax.f32 %v229_v58, 0.0  ;;  %v300_v49 = vand.u32 2147483648, %v1228_v14  ;;  %v1067_v61 = vmov 0  }
  0xbb   : > { %v282_v26 = vsub.f32 1.5, %v281_v10  ;;  %v269_v13 = vmul.f32 0.5, %v268_v18  ;;  %v988_v40 = vpop.eup %987  ;;  %991 = vrsqrt.f32 %v1325_v45  ;;  %976 = vset.pattern.permute.xlu1 %v1067_v61  ;;  %978 = vset.pattern.permute.xlu0 %v1067_v61  ;;  %v276_v18 = vand.u32 2147483648, %v1230_v15 }
  0xbc   : > { %v294_v33 = vsub.f32 1.5, %v293_v25  ;;  %v327_v46 = vmul.f32 %v988_v40, %v1292_v32  ;;  %977 = vset.pattern.permute.xlu2 %v1067_v61  ;;  %v990_v58 = vpop.eup %989  ;;  %v245_v25 = vmul.f32 0.003921569, %v237_v63  ;;  %vm309_vm13 = vcmp.eq.f32.partialorder %v1325_v45, inf }
  0xbd   : > { %v283_v48 = vmul.f32 %v982_v6, %v282_v26  ;;  %v270_v56 = vsub.f32 1.5, %v269_v13  ;;  %v315_v13 = vmul.f32 %v990_v58, %v1303_v52  ;;  %vm311_vm14 = vcmp.eq.f32.partialorder %v1325_v45, 0.0 }
  0xbe   : > { %v295_v57 = vmul.f32 %v984_v21, %v294_v33  ;;  %v328_v21 = vmul.f32 %v988_v40, %v327_v46  ;;  %v1338_v33 = vstv %s1313_s26  ;;  %v1344_v20 = vadd.f32 1e-05, %v245_v25 }
  0xbf   : > { %v284_v6 = vmul.f32 %v283_v48, %v1226_v11  ;;  %v271_v10 = vmul.f32 %v986_v39, %v270_v56  ;;  %v1347_v48 = vstv %s1318_s27  ;;  %v316_v56 = vmul.f32 %v990_v58, %v315_v13 }
  0xc0   : > { %v296_v26 = vmul.f32 %v295_v57, %v1228_v14  ;;  %v329_v57 = vmul.f32 0.5, %v328_v21  ;;  %993 = vrsqrt.f32 %v1344_v20  ;;  %vm345_vm15 = vcmp.eq.f32.partialorder %v1344_v20, inf }
  0xc1   : > { %v286_v5 = vsel %vm285_vm3, %v1226_v11, %v284_v6  ;;  %v272_v61 = vmul.f32 %v271_v10, %v1230_v15  ;;  %v406_v46 = vld [vmem:[#allocation3 + $0x6] sm:$0xff]  ;;  %v992_v4 = vpop.eup %991  ;;  %vm347_vm1 = vcmp.eq.f32.partialorder %v1344_v20, 0.0 }
  0xc2   : > { %v289_v39 = vsel %vm287_vm4, %v288_v44, %v286_v5  ;;  %v298_v63 = vsel %vm297_vm5, %v1228_v14, %v296_v26  ;;  %v458_v12 = vld [vmem:[#allocation3 + $0x7] sm:$0xff]  ;;  %v317_v44 = vmul.f32 0.5, %v316_v56  ;;  %v330_v25 = vsub.f32 1.5, %v329_v57 }
  0xc3   : > { %381 = vst.msk [vmem:[#allocation3 + $0x18] sm:$0xff] %vm350_vm0, %v289_v39  ;;  %v301_v6 = vsel %vm299_vm6, %v300_v49, %v298_v63  ;;  %v274_v10 = vsel %vm273_vm7, %v1230_v15, %v272_v61  ;;  %v510_v11 = vld [vmem:[#allocation3 + $0x8] sm:$0xff]  ;;  %v303_v26 = vmul.f32 %v992_v4, %v1325_v45  ;;  %v415_v14 = vmul.f32 %v1295_v37, %v406_v46 }
  0xc4   : > { %382 = vst.msk [vmem:[#allocation3 + $0x20] sm:$0xff] %vm350_vm0, %v301_v6  ;;  %v277_v5 = vsel %vm275_vm8, %v276_v18, %v274_v10  ;;  %v467_v49 = vmul.f32 %v1300_v47, %v458_v12  ;;  %v318_v13 = vsub.f32 1.5, %v317_v44  ;;  %v331_v21 = vmul.f32 %v988_v40, %v330_v25 }
  0xc5   : > { %380 = vst.msk [vmem:[#allocation3 + $0x10] sm:$0xff] %vm350_vm0, %v277_v5  ;;  %v304_v61 = vmul.f32 %v992_v4, %v303_v26  ;;  %v519_v15 = vmul.f32 %v1311_v19, %v510_v11  ;;  %v324_v18 = vand.u32 2147483648, %v1303_v52  ;;  %v423_v39 = vadd.f32 %v415_v14, %v1176_v28 }
  0xc6   : > { %v475_v63 = vadd.f32 %v467_v49, %v1185_v34  ;;  %v319_v56 = vmul.f32 %v990_v58, %v318_v13  ;;  %v332_v57 = vmul.f32 %v331_v21, %v1292_v32  ;;  %v336_v46 = vand.u32 2147483648, %v1292_v32  ;;  %v994_v12 = vpop.eup %993 }
  0xc7   : > { %v305_v6 = vmul.f32 0.5, %v304_v61  ;;  %v527_v10 = vadd.f32 %v519_v15, %v1188_v38  ;;  %v339_v58 = vmul.f32 %v994_v12, %v1344_v20  ;;  %v312_v25 = vand.u32 2147483648, %v1325_v45 }
  0xc8   : > { %v483_v40 = vadd.f32 %v475_v63, %v423_v39  ;;  %v320_v11 = vmul.f32 %v319_v56, %v1303_v52  ;;  %v334_v28 = vsel %vm333_vm9, %v1292_v32, %v332_v57  ;;  %v348_v26 = vand.u32 2147483648, %v1344_v20 }
  0xc9   : > { %v306_v34 = vsub.f32 1.5, %v305_v6  ;;  %v337_v44 = vsel %vm335_vm11, %v336_v46, %v334_v28  ;;  %v340_v21 = vmul.f32 %v994_v12, %v339_v58 }
  0xca   : > { %v512_v5 = vld [vmem:[#allocation3 + $0x18] sm:$0xff]  ;;  %v322_v49 = vsel %vm321_vm10, %v1303_v52, %v320_v11  ;;  %385 = vst.msk [vmem:[#allocation3 + $0x38] sm:$0xff] %vm350_vm0, %v337_v44  ;;  %v535_v61 = vadd.f32 %v527_v10, %v483_v40 }
  0xcb   : > { %v521_v14 = vmul.f32 %v1311_v19, %v512_v5  ;;  %v564_v38 = vld [vmem:[#allocation3 + $0x19] sm:$0xff]  ;;  %v307_v13 = vmul.f32 %v992_v4, %v306_v34  ;;  %v325_v63 = vsel %vm323_vm12, %v324_v18, %v322_v49  ;;  %v341_v40 = vmul.f32 0.5, %v340_v21 }
  0xcc   : > { %v562_v15 = vld [vmem:[#allocation3 + $0x9] sm:$0xff]  ;;  %v408_v32 = vld [vmem:[#allocation3 + $0x16] sm:$0xff]  ;;  %384 = vst.msk [vmem:[#allocation3 + $0x30] sm:$0xff] %vm350_vm0, %v325_v63  ;;  %v573_v18 = vmul.f32 %v1338_v33, %v564_v38 }
  0xcd   : > { %v614_v39 = vld [vmem:[#allocation3 + $0xa] sm:$0xff]  ;;  %v571_v56 = vmul.f32 %v1338_v33, %v562_v15  ;;  %v417_v46 = vmul.f32 %v1295_v37, %v408_v32  ;;  %v460_v6 = vld [vmem:[#allocation3 + $0x17] sm:$0xff]  ;;  %v308_v4 = vmul.f32 %v307_v13, %v1325_v45  ;;  %v529_v44 = vadd.f32 %v521_v14, %v1179_v29 }
  0xce   : > { %v623_v57 = vmul.f32 %v1347_v48, %v614_v39  ;;  %v616_v11 = vld [vmem:[#allocation3 + $0x1a] sm:$0xff]  ;;  %v469_v52 = vmul.f32 %v1300_v47, %v460_v6  ;;  %v407_v10 = vld [vmem:[#allocation3 + $0xe] sm:$0xff]  ;;  %v342_v21 = vsub.f32 1.5, %v341_v40  ;;  %v581_v63 = vadd.f32 %v573_v18, %v1205_v54 }
  0xcf   : > { %v459_v28 = vld [vmem:[#allocation3 + $0xf] sm:$0xff]  ;;  %v579_v34 = vadd.f32 %v571_v56, %v1202_v53  ;;  %v425_v5 = vadd.f32 %v417_v46, %v1214_v0  ;;  %v310_v13 = vsel %vm309_vm13, %v1325_v45, %v308_v4  ;;  %v625_v38 = vmul.f32 %v1347_v48, %v616_v11 }
  0xd0   : > { %v631_v58 = vadd.f32 %v623_v57, %v1211_v62  ;;  %v511_v49 = vld [vmem:[#allocation3 + $0x10] sm:$0xff]  ;;  %v477_v15 = vadd.f32 %v469_v52, %v1217_v1  ;;  %v313_v53 = vsel %vm311_vm14, %v312_v25, %v310_v13  ;;  %v416_v62 = vmul.f32 %v1295_v37, %v407_v10  ;;  %v409_v57 = vld [vmem:[#allocation3 + $0x1e] sm:$0xff] }
  0xd1   : > { %v563_v39 = vld [vmem:[#allocation3 + $0x11] sm:$0xff]  ;;  %v587_v32 = vadd.f32 %v579_v34, %v535_v61  ;;  %v468_v0 = vmul.f32 %v1300_v47, %v459_v28  ;;  %383 = vst.msk [vmem:[#allocation3 + $0x28] sm:$0xff] %vm350_vm0, %v313_v53  ;;  %v343_v29 = vmul.f32 %v994_v12, %v342_v21  ;;  %v520_v56 = vmul.f32 %v1311_v19, %v511_v49  ;;  %v461_v61 = vld [vmem:[#allocation3 + $0x1f] sm:$0xff] }
  0xd2   : > { %v485_v14 = vadd.f32 %v477_v15, %v425_v5  ;;  %v615_v1 = vld [vmem:[#allocation3 + $0x12] sm:$0xff]  ;;  %v424_v6 = vadd.f32 %v416_v62, %v1220_v2  ;;  %v572_v25 = vmul.f32 %v1338_v33, %v563_v39  ;;  %v633_v12 = vadd.f32 %v625_v38, %v1208_v55  ;;  %v513_v28 = vld [vmem:[#allocation3 + $0x20] sm:$0xff] }
  0xd3   : > { %v639_v46 = vadd.f32 %v631_v58, %v587_v32  ;;  %v476_v45 = vadd.f32 %v468_v0, %v1223_v3  ;;  %v344_v11 = vmul.f32 %v343_v29, %v1344_v20  ;;  %v528_v40 = vadd.f32 %v520_v56, %v1235_v22  ;;  %v394_v2 = vld [vmem:[#allocation2 + $0x36] sm:$0xff] }
  0xd4   : > { %v537_v4 = vadd.f32 %v529_v44, %v485_v14  ;;  %v624_v18 = vmul.f32 %v1347_v48, %v615_v1  ;;  %v418_v10 = vmul.f32 %v1295_v37, %v409_v57  ;;  %v580_v58 = vadd.f32 %v572_v25, %v1238_v23  ;;  %v446_v55 = vld [vmem:[#allocation2 + $0x37] sm:$0xff] }
  0xd5   : > { %v953_v54 = vmul.f32 -1.442695, %v639_v46  ;;  %v484_v52 = vadd.f32 %v476_v45, %v424_v6  ;;  %v346_v3 = vsel %vm345_vm15, %v1344_v20, %v344_v11  ;;  %v470_v5 = vmul.f32 %v1300_v47, %v461_v61  ;;  %v498_v44 = vld [vmem:[#allocation2 + $0x38] sm:$0xff] }
  0xd6   : > { %v589_v34 = vadd.f32 %v581_v63, %v537_v4  ;;  %v349_v22 = vsel %vm347_vm1, %v348_v26, %v346_v3  ;;  %v426_v13 = vadd.f32 %v418_v10, %v1241_v24  ;;  %v522_v23 = vmul.f32 %v1311_v19, %v513_v28  ;;  %v550_v1 = vld [vmem:[#allocation2 + $0x39] sm:$0xff] }
  0xd7   : > { %995 = vpow2.f32 %v953_v54  ;;  %v536_v49 = vadd.f32 %v528_v40, %v484_v52  ;;  %386 = vst.msk [vmem:[#allocation3 + $0x40] sm:$0xff] %vm350_vm0, %v349_v22  ;;  %v478_v15 = vadd.f32 %v470_v5, %v1250_v31  ;;  %v1444_v38 = vmul.f32 %v1158_v7, %v394_v2  ;;  %v395_v10 = vld [vmem:[#allocation2 + $0x3e] sm:$0xff] }
  0xd8   : > { %v641_v21 = vadd.f32 %v633_v12, %v589_v34  ;;  %v632_v53 = vadd.f32 %v624_v18, %v1247_v27  ;;  %v565_v32 = vld [vmem:[#allocation3 + $0x21] sm:$0xff]  ;;  %v1448_v62 = vmul.f32 %v1160_v8, %v446_v55  ;;  %v1451_v24 = vmul.f32 %v1162_v9, %v498_v44  ;;  %v566_v45 = vld [vmem:[#allocation3 + $0x29] sm:$0xff]  ;;  %v551_v44 = vld [vmem:[#allocation2 + $0x41] sm:$0xff] }
  0xd9   : > { %v588_v39 = vadd.f32 %v580_v58, %v536_v49  ;;  %v617_v20 = vld [vmem:[#allocation3 + $0x22] sm:$0xff]  ;;  %v486_v29 = vadd.f32 %v478_v15, %v426_v13  ;;  %v530_v31 = vadd.f32 %v522_v23, %v1257_v35  ;;  %v574_v14 = vmul.f32 %v1338_v33, %v565_v32  ;;  %v411_v35 = vld [vmem:[#allocation3 + $0x2e] sm:$0xff] }
  0xda   : > { %v410_v26 = vld [vmem:[#allocation3 + $0x26] sm:$0xff]  ;;  %v955_v0 = vmul.f32 -1.442695, %v641_v21  ;;  %v626_v27 = vmul.f32 %v1347_v48, %v617_v20  ;;  %v1463_v52 = vmul.f32 %v1168_v16, %v550_v1  ;;  %v575_v3 = vmul.f32 %v1338_v33, %v566_v45  ;;  %v447_v34 = vld [vmem:[#allocation2 + $0x3f] sm:$0xff] }
  0xdb   : > { %v462_v63 = vld [vmem:[#allocation3 + $0x27] sm:$0xff]  ;;  %v640_v57 = vadd.f32 %v632_v53, %v588_v39  ;;  %v419_v46 = vmul.f32 %v1295_v37, %v410_v26  ;;  %v538_v9 = vadd.f32 %v530_v31, %v486_v29  ;;  %v582_v25 = vadd.f32 %v574_v14, %v1260_v36  ;;  %v463_v5 = vld [vmem:[#allocation3 + $0x2f] sm:$0xff] }
  0xdc   : > { %v514_v56 = vld [vmem:[#allocation3 + $0x28] sm:$0xff]  ;;  %v471_v6 = vmul.f32 %v1300_v47, %v462_v63  ;;  %997 = vpow2.f32 %v955_v0  ;;  %v634_v36 = vadd.f32 %v626_v27, %v1267_v50  ;;  %v515_v55 = vld [vmem:[#allocation3 + $0x30] sm:$0xff]  ;;  %v1477_v50 = vmul.f32 %v1158_v7, %v395_v10 }
  0xdd   : > { %v523_v61 = vmul.f32 %v1311_v19, %v514_v56  ;;  %v996_v11 = vpop.eup %995  ;;  %v954_v4 = vmul.f32 -1.442695, %v640_v57  ;;  %v427_v12 = vadd.f32 %v419_v46, %v1270_v51  ;;  %v618_v54 = vld [vmem:[#allocation3 + $0x2a] sm:$0xff]  ;;  %v590_v2 = vadd.f32 %v582_v25, %v538_v9  ;;  %v619_v26 = vld [vmem:[#allocation3 + $0x32] sm:$0xff] }
  0xde   : > { %v479_v40 = vadd.f32 %v471_v6, %v1274_v59  ;;  %v602_v18 = vld [vmem:[#allocation2 + $0x3a] sm:$0xff]  ;;  %v1465_v28 = vadd.f32 1.0, %v996_v11  ;;  %v420_v59 = vmul.f32 %v1295_v37, %v411_v35  ;;  %v627_v22 = vmul.f32 %v1347_v48, %v618_v54  ;;  %v412_v0 = vld [vmem:[#allocation3 + $0x36] sm:$0xff] }
  0xdf   : > { %999 = vpow2.f32 %v954_v4  ;;  %v531_v51 = vadd.f32 %v523_v61, %v1182_v30  ;;  %v1474_v49 = vmul.f32 %v1170_v17, %v602_v18  ;;  %v642_v13 = vadd.f32 %v634_v36, %v590_v2  ;;  %v567_v30 = vld [vmem:[#allocation3 + $0x31] sm:$0xff] }
  0xe0   : > { %v487_v58 = vadd.f32 %v479_v40, %v427_v12  ;;  %1001 = vrcp.f32 %v1465_v28  ;;  %v583_v15 = vadd.f32 %v575_v3, %v1191_v41  ;;  %v1481_v23 = vmul.f32 %v1160_v8, %v447_v34  ;;  %v603_v29 = vld [vmem:[#allocation2 + $0x42] sm:$0xff]  ;;  %v1621_v12 = vld [vmem:[#allocation9_spill] sm:$0xff] }
  0xe1   : > { %v428_v53 = vadd.f32 %v420_v59, %v1197_v43  ;;  %v472_v32 = vmul.f32 %v1300_v47, %v463_v5  ;;  %v524_v20 = vmul.f32 %v1311_v19, %v515_v55  ;;  %v1487_v7 = vmul.f32 %v1168_v16, %v551_v44  ;;  %v464_v25 = vld [vmem:[#allocation3 + $0x37] sm:$0xff] }
  0xe2   : > { %v539_v21 = vadd.f32 %v531_v51, %v487_v58  ;;  %v998_v39 = vpop.eup %997  ;;  %v688_v31 = vand.u32 2147483647, %v1465_v28  ;;  %v956_v14 = vmul.f32 -1.442695, %v642_v13  ;;  %v690_v63 = vand.u32 2147483648, %v1465_v28  ;;  %v1620_v35 = vld [vmem:[#allocation7_spill] sm:$0xff] }
  0xe3   : > { %v1490_v41 = vadd.f32 1.0, %v998_v39  ;;  %v635_v43 = vadd.f32 %v627_v22, %v1194_v42  ;;  %v480_v56 = vadd.f32 %v472_v32, %v1277_v60  ;;  %v576_v1 = vmul.f32 %v1338_v33, %v567_v30  ;;  %v516_v36 = vld [vmem:[#allocation3 + $0x38] sm:$0xff]  ;;  %v1622_v58 = vld [vmem:[#allocation10_spill] sm:$0xff] }
  0xe4   : > { %v591_v8 = vadd.f32 %v583_v15, %v539_v21  ;;  %v628_v16 = vmul.f32 %v1347_v48, %v619_v26  ;;  %v421_v27 = vmul.f32 %v1295_v37, %v412_v0  ;;  %v1500_v46 = vmul.f32 %v1170_v17, %v603_v29  ;;  %v568_v3 = vld [vmem:[#allocation3 + $0x39] sm:$0xff] }
  0xe5   : > { %v1000_v57 = vpop.eup %999  ;;  %1003 = vrcp.f32 %v1490_v41  ;;  %v488_v42 = vadd.f32 %v480_v56, %v428_v53  ;;  %vm684_vm0 = vweird.f32 %v1465_v28  ;;  %vm1506_vm2 = vcmp.eq.f32.partialorder %v688_v31, 8.507059e+37  ;;  %v620_v29 = vld [vmem:[#allocation3 + $0x3a] sm:$0xff] }
  0xe6   : > { %v1002_v6 = vpop.eup %1001  ;;  %v1502_v45 = vadd.f32 1.0, %v1000_v57  ;;  %1005 = vpow2.f32 %v956_v14  ;;  %v643_v9 = vadd.f32 %v635_v43, %v591_v8  ;;  %v532_v11 = vadd.f32 %v524_v20, %v1620_v35 }
  0xe7   : > { %v680_v60 = vmul.f32 %v1002_v6, %v1465_v28  ;;  %v691_v4 = vor.u32 1.1754944e-38, %v690_v63  ;;  %v718_v17 = vand.u32 2147483647, %v1490_v41  ;;  %v584_v40 = vadd.f32 %v576_v1, %v1621_v12  ;;  %v413_v63 = vld [vmem:[#allocation3 + $0x3e] sm:$0xff] }
  0xe8   : > { %1007 = vrcp.f32 %v1502_v45  ;;  %v957_v18 = vmul.f32 -1.442695, %v643_v9  ;;  %v540_v10 = vadd.f32 %v532_v11, %v488_v42  ;;  %v473_v2 = vmul.f32 %v1300_v47, %v464_v25  ;;  %v465_v42 = vld [vmem:[#allocation3 + $0x3f] sm:$0xff] }
  0xe9   : > { %v681_v54 = vsub.f32 1.0, %v680_v60  ;;  %vm685_vm3 = vweird.f32 %v1002_v6  ;;  %v720_v34 = vand.u32 2147483648, %v1490_v41  ;;  %v636_v51 = vadd.f32 %v628_v16, %v1622_v58 }
  0xea   : > { %v429_v59 = vadd.f32 %v421_v27, %v1444_v38  ;;  %1009 = vpow2.f32 %v957_v18  ;;  %v592_v44 = vadd.f32 %v584_v40, %v540_v10  ;;  %v481_v22 = vadd.f32 %v473_v2, %v1448_v62  ;;  %vm686_vm6 = vmor %vm684_vm0, %vm685_vm3 }
  0xeb   : > { %v1004_v5 = vpop.eup %1003  ;;  %v682_v55 = vmul.f32 %v1002_v6, %v681_v54  ;;  %vm714_vm4 = vweird.f32 %v1490_v41  ;;  %v525_v15 = vmul.f32 %v1311_v19, %v516_v36  ;;  %v577_v30 = vmul.f32 %v1338_v33, %v568_v3  ;;  %v517_v54 = vld [vmem:[#allocation3 + $0x40] sm:$0xff] }
  0xec   : > { %v1006_v13 = vpop.eup %1005  ;;  %v710_v21 = vmul.f32 %v1004_v5, %v1490_v41  ;;  %vm1523_vm5 = vcmp.eq.f32.partialorder %v718_v17, 8.507059e+37  ;;  %v644_v32 = vadd.f32 %v636_v51, %v592_v44  ;;  %vm715_vm7 = vweird.f32 %v1004_v5 }
  0xed   : > { %v683_v39 = vadd.f32 %v1002_v6, %v682_v55  ;;  %v1527_v38 = vadd.f32 1.0, %v1006_v13  ;;  %v721_v26 = vor.u32 1.1754944e-38, %v720_v34  ;;  %v703_v0 = vand.u32 2147483647, %v1502_v45  ;;  %vm716_vm8 = vmor %vm714_vm4, %vm715_vm7 }
  0xee   : > { %v1008_v20 = vpop.eup %1007  ;;  %v711_v62 = vsub.f32 1.0, %v710_v21  ;;  %v489_v8 = vadd.f32 %v481_v22, %v429_v59  ;;  %v533_v28 = vadd.f32 %v525_v15, %v1451_v24  ;;  %v585_v1 = vadd.f32 %v577_v30, %v1463_v52 }
  0xef   : > { %v687_v31 = vsel %vm686_vm6, %v1002_v6, %v683_v39  ;;  %v695_v14 = vmul.f32 %v1008_v20, %v1502_v45  ;;  %1011 = vrcp.f32 %v1527_v38  ;;  %v958_v9 = vmul.f32 -1.442695, %v644_v32 }
  0xf0   : > { %v692_v43 = vsel %vm1506_vm2, %v691_v4, %v687_v31  ;;  %v712_v56 = vmul.f32 %v1004_v5, %v711_v62  ;;  %v1010_v57 = vpop.eup %1009  ;;  %v629_v6 = vmul.f32 %v1347_v48, %v620_v29  ;;  %v705_v60 = vand.u32 2147483648, %v1502_v45 }
  0xf1   : > { %v799_v16 = vadd.f32 1.0, %v692_v43  ;;  %v696_v27 = vsub.f32 1.0, %v695_v14  ;;  %v1541_v35 = vadd.f32 1.0, %v1010_v57  ;;  %v422_v61 = vmul.f32 %v1295_v37, %v413_v63 }
  0xf2   : > { %v713_v25 = vadd.f32 %v1004_v5, %v712_v56  ;;  %vm700_vm9 = vweird.f32 %v1008_v20  ;;  %1013 = vpow2.f32 %v958_v9  ;;  %v541_v52 = vadd.f32 %v533_v28, %v489_v8 }
  0xf3   : > { %809 = vperm.xlu1 %976, %v799_v16   ;;  %v697_v24 = vmul.f32 %v1008_v20, %v696_v27  ;;  %vm699_vm10 = vweird.f32 %v1502_v45  ;;  %1015 = vrcp.f32 %v1541_v35  ;;  %v474_v4 = vmul.f32 %v1300_v47, %v465_v42  ;;  %v569_v45 = vld [vmem:[#allocation3 + $0x41] sm:$0xff] }
  0xf4   : > { %v717_v11 = vsel %vm716_vm8, %v1004_v5, %v713_v25  ;;  %v593_v40 = vadd.f32 %v585_v1, %v541_v52  ;;  %v637_v41 = vadd.f32 %v629_v6, %v1474_v49  ;;  %vm701_vm11 = vmor %vm699_vm10, %vm700_vm9  ;;  %vm704_vm12 = vcmp.eq.f32.partialorder %v703_v0, 8.507059e+37  ;;  %v621_v5 = vld [vmem:[#allocation3 + $0x42] sm:$0xff] }
  0xf5   : > { %v1012_v17 = vpop.eup %1011  ;;  %v722_v37 = vsel %vm1523_vm5, %v721_v26, %v717_v11  ;;  %v698_v12 = vadd.f32 %v1008_v20, %v697_v24  ;;  %v706_v10 = vor.u32 1.1754944e-38, %v705_v60  ;;  %v733_v3 = vand.u32 2147483647, %v1527_v38 }
  0xf6   : > { %v801_v18 = vadd.f32 1.0, %v722_v37  ;;  %v725_v2 = vmul.f32 %v1012_v17, %v1527_v38  ;;  %v645_v47 = vadd.f32 %v637_v41, %v593_v40  ;;  %v430_v34 = vadd.f32 %v422_v61, %v1477_v50 }
  0xf7   : > { %v702_v36 = vsel %vm701_vm11, %v1008_v20, %v698_v12  ;;  %v482_v59 = vadd.f32 %v474_v4, %v1481_v23  ;;  %v526_v49 = vmul.f32 %v1311_v19, %v517_v54  ;;  %v735_v22 = vand.u32 2147483648, %v1527_v38  ;;  %v1625_v23 = vld [vmem:[#allocation8_spill] sm:$0xff] }
  0xf8   : > { %819 = vperm.xlu0 %978, %v801_v18   ;;  %v707_v58 = vsel %vm704_vm12, %v706_v10, %v702_v36  ;;  %v726_v51 = vsub.f32 1.0, %v725_v2  ;;  %v1014_v55 = vpop.eup %1013  ;;  %v959_v13 = vmul.f32 -1.442695, %v645_v47  ;;  %v578_v21 = vmul.f32 %v1338_v33, %v569_v45 }
  0xf9   : > { %v800_v44 = vadd.f32 1.0, %v707_v58  ;;  %v1016_v15 = vpop.eup %1015  ;;  %vm730_vm13 = vweird.f32 %v1012_v17  ;;  %v676_v39 = vadd.f32 1.0, %v1014_v55  ;;  %v490_v50 = vadd.f32 %v482_v59, %v430_v34 }
  0xfa   : > { %v727_v30 = vmul.f32 %v1012_v17, %v726_v51  ;;  %v740_v53 = vmul.f32 %v1016_v15, %v1541_v35  ;;  %1017 = vpow2.f32 %v959_v13  ;;  %v534_v32 = vadd.f32 %v526_v49, %v1625_v23 }
  0xfb   : > { %814 = vperm.xlu2 %977, %v800_v44   ;;  %v630_v19 = vmul.f32 %v1347_v48, %v621_v5  ;;  %vm729_vm14 = vweird.f32 %v1527_v38  ;;  %vm734_vm15 = vcmp.eq.f32.partialorder %v733_v3, 8.507059e+37  ;;  %1019 = vrcp.f32 %v676_v39 }
  0xfc   : > { %v728_v20 = vadd.f32 %v1012_v17, %v727_v30  ;;  %vm731_vm1 = vmor %vm729_vm14, %vm730_vm13  ;;  %v736_v33 = vor.u32 1.1754944e-38, %v735_v22  ;;  %v741_v62 = vsub.f32 1.0, %v740_v53  ;;  %v542_v26 = vadd.f32 %v534_v32, %v490_v50  ;;  %v1028_v53 = vld [vmem:[%s1102_s17 + $0x18] sm:$0xff] }
  0xfd   : > { %v586_v0 = vadd.f32 %v578_v21, %v1487_v7  ;;  %vm745_vm0 = vweird.f32 %v1016_v15  ;;  %v748_v31 = vand.u32 2147483647, %v1541_v35  ;;  %v750_v14 = vand.u32 2147483648, %v1541_v35 }
  0xfe   : > { %v732_v29 = vsel %vm731_vm1, %v1012_v17, %v728_v20  ;;  %v742_v63 = vmul.f32 %v1016_v15, %v741_v62  ;;  %v638_v43 = vadd.f32 %v630_v19, %v1500_v46  ;;  %vm744_vm2 = vweird.f32 %v1541_v35  ;;  %v1029_v19 = vld [vmem:[%s1102_s17 + $0x30] sm:$0xff] }
  0xff   : > { %v737_v8 = vsel %vm734_vm15, %v736_v33, %v732_v29  ;;  %v594_v48 = vadd.f32 %v586_v0, %v542_v26  ;;  %vm746_vm3 = vmor %vm744_vm2, %vm745_vm0  ;;  %v751_v7 = vor.u32 1.1754944e-38, %v750_v14  ;;  %vm749_vm4 = vcmp.eq.f32.partialorder %v748_v31, 8.507059e+37  ;;  %v1030_v33 = vld [vmem:[%s1102_s17 + $0x38] sm:$0xff]  ;;  %v1031_v0 = vld [vmem:[%s1102_s17] sm:$0xff] }
 0x100   : > { %v1018_v38 = vpop.eup %1017  ;;  %v802_v56 = vadd.f32 1.0, %v737_v8  ;;  %v743_v28 = vadd.f32 %v1016_v15, %v742_v63  ;;  %v765_v46 = vand.u32 2147483648, %v676_v39  ;;  %v763_v35 = vand.u32 2147483647, %v676_v39  ;;  %v1032_v31 = vld [vmem:[%s1102_s17 + $0x8] sm:$0xff]  ;;  %v1033_v63 = vld [vmem:[%s1102_s17 + $0x50] sm:$0xff] }
 0x101   : > { %v646_v1 = vadd.f32 %v638_v43, %v594_v48  ;;  %v1020_v57 = vpop.eup %1019  ;;  %v677_v16 = vadd.f32 1.0, %v1018_v38  ;;  %vm759_vm6 = vweird.f32 %v676_v39  ;;  %v1034_v43 = vld [vmem:[%s1102_s17 + $0x58] sm:$0xff] }
 0x102   : > { %v747_v27 = vsel %vm746_vm3, %v1016_v15, %v743_v28  ;;  %v755_v9 = vmul.f32 %v1020_v57, %v676_v39  ;;  %vm760_vm5 = vweird.f32 %v1020_v57  ;;  %v766_v11 = vor.u32 1.1754944e-38, %v765_v46  ;;  %v1027_v39 = vld [vmem:[%s1102_s17 + $0x10] sm:$0xff]  ;;  %v1035_v28 = vld [vmem:[%s1102_s17 + $0x20] sm:$0xff] }
 0x103   : > { %824 = vperm.xlu2 %977, %v802_v56   ;;  %v960_v6 = vmul.f32 -1.442695, %v646_v1  ;;  %v752_v42 = vsel %vm749_vm4, %v751_v7, %v747_v27  ;;  %1021 = vrcp.f32 %v677_v16  ;;  %vm761_vm7 = vmor %vm759_vm6, %vm760_vm5  ;;  %vm764_vm8 = vcmp.eq.f32.partialorder %v763_v35, 8.507059e+37  ;;  %v1037_v27 = vld [vmem:[%s1102_s17 + $0x40] sm:$0xff] }
 0x104   : > { %v803_v25 = vadd.f32 1.0, %v752_v42  ;;  %v756_v60 = vsub.f32 1.0, %v755_v9  ;;  %v780_v18 = vand.u32 2147483648, %v677_v16  ;;  %v778_v2 = vand.u32 2147483647, %v677_v16 }
 0x105   : > { %1023 = vpow2.f32 %v960_v6  ;;  %vm774_vm10 = vweird.f32 %v677_v16  ;;  %v1038_v6 = vld [vmem:[%s1102_s17 + $0x48] sm:$0xff] }
 0x106   : > { %829 = vperm.xlu1 %976, %v803_v25   ;;  %v757_v61 = vmul.f32 %v1020_v57, %v756_v60  ;;  %v781_v36 = vor.u32 1.1754944e-38, %v780_v18  ;;  %vm779_vm12 = vcmp.eq.f32.partialorder %v778_v2, 8.507059e+37  ;;  %v1039_v60 = vld [vmem:[%s1102_s17 + $0x70] sm:$0xff] }
 0x108   : > { %v758_v24 = vadd.f32 %v1020_v57, %v757_v61  ;;  %v1040_v61 = vld [vmem:[%s1102_s17 + $0x78] sm:$0xff] }
 0x109   : > { %v1022_v52 = vpop.eup %1021 }
 0x10a   : > { %v762_v17 = vsel %vm761_vm7, %v1020_v57, %v758_v24  ;;  %v770_v37 = vmul.f32 %v1022_v52, %v677_v16  ;;  %vm775_vm9 = vweird.f32 %v1022_v52  ;;  %v1036_v57 = vld [vmem:[%s1102_s17 + $0x28] sm:$0xff] }
 0x10b   : > { %v1024_v4 = vpop.eup %1023  ;;  %v767_v12 = vsel %vm764_vm8, %v766_v11, %v762_v17  ;;  %vm776_vm11 = vmor %vm774_vm10, %vm775_vm9 }
 0x10c   : > { %v678_v40 = vadd.f32 1.0, %v1024_v4  ;;  %v804_v41 = vadd.f32 1.0, %v767_v12  ;;  %v771_v54 = vsub.f32 1.0, %v770_v37  ;;  %v1042_v4 = vld [vmem:[%s1102_s17 + $0x68] sm:$0xff] }
 0x10e   : > { %1025 = vrcp.f32 %v678_v40  ;;  %834 = vperm.xlu2 %977, %v804_v41   ;;  %v772_v10 = vmul.f32 %v1022_v52, %v771_v54  ;;  %v795_v49 = vand.u32 2147483648, %v678_v40  ;;  %v793_v55 = vand.u32 2147483647, %v678_v40 }
 0x10f   : > { %vm789_vm14 = vweird.f32 %v678_v40 }
 0x110   : > { %v773_v45 = vadd.f32 %v1022_v52, %v772_v10  ;;  %v796_v22 = vor.u32 1.1754944e-38, %v795_v49  ;;  %vm794_vm1 = vcmp.eq.f32.partialorder %v793_v55, 8.507059e+37 }
 0x112   : > { %v777_v3 = vsel %vm776_vm11, %v1022_v52, %v773_v45  ;;  %v1041_v52 = vld [vmem:[%s1102_s17 + $0x60] sm:$0xff] }
 0x113   : > { %v782_v34 = vsel %vm779_vm12, %v781_v36, %v777_v3 }
 0x114   : > { %v1026_v47 = vpop.eup %1025  ;;  %v805_v58 = vadd.f32 1.0, %v782_v34 }
 0x115   : > { %v785_v51 = vmul.f32 %v1026_v47, %v678_v40  ;;  %vm790_vm13 = vweird.f32 %v1026_v47 }
 0x116   : > { %839 = vperm.xlu1 %976, %v805_v58   ;;  %vm791_vm15 = vmor %vm789_vm14, %vm790_vm13 }
 0x117   : > { %v786_v59 = vsub.f32 1.0, %v785_v51 }
 0x119   : > { %v787_v5 = vmul.f32 %v1026_v47, %v786_v59 }
 0x11b   : > { %v788_v44 = vadd.f32 %v1026_v47, %v787_v5 }
 0x11d   : > { %v792_v13 = vsel %vm791_vm15, %v1026_v47, %v788_v44 }
 0x11e   : > { %v797_v21 = vsel %vm794_vm1, %v796_v22, %v792_v13 }
 0x11f   : > { %v806_v15 = vadd.f32 1.0, %v797_v21 }
 0x121   : > { %844 = vperm.xlu2 %977, %v806_v15  }
 0x155   : > { %v815_v30 = vpop.permute.xlu2 %814 }
 0x156   : > { %v849_v50 = vmul.f32 %v1027_v39, %v815_v30  ;;  %v850_v23 = vmul.f32 %v1028_v53, %v815_v30 }
 0x158   : > { %865 = vst [vmem:[%s1574_s30 + $0x10] sm:$0xff] %v849_v50 }
 0x159   : > { %866 = vst [vmem:[%s1574_s30 + $0x18] sm:$0xff] %v850_v23 }
 0x15d   : > { %v825_v32 = vpop.permute.xlu2 %824 }
 0x15e   : > { %v853_v20 = vmul.f32 %v1029_v19, %v825_v32  ;;  %v854_v62 = vmul.f32 %v1030_v33, %v825_v32 }
 0x160   : > { %869 = vst [vmem:[%s1574_s30 + $0x30] sm:$0xff] %v853_v20 }
 0x161   : > { %870 = vst [vmem:[%s1574_s30 + $0x38] sm:$0xff] %v854_v62 }
 0x165   : > { %v810_v26 = vpop.permute.xlu1 %809 }
 0x166   : > { %v847_v29 = vmul.f32 %v1031_v0, %v810_v26  ;;  %v848_v14 = vmul.f32 %v1032_v31, %v810_v26 }
 0x168   : > { %863 = vst [vmem:[%s1574_s30] sm:$0xff] %v847_v29  ;;  %v835_v8 = vpop.permute.xlu2 %834 }
 0x169   : > { %864 = vst [vmem:[%s1574_s30 + $0x8] sm:$0xff] %v848_v14  ;;  %v857_v48 = vmul.f32 %v1033_v63, %v835_v8  ;;  %v858_v38 = vmul.f32 %v1034_v43, %v835_v8 }
 0x16a   : > { %v820_v56 = vpop.permute.xlu0 %819 }
 0x16b   : > { %v851_v1 = vmul.f32 %v1035_v28, %v820_v56  ;;  %v852_v7 = vmul.f32 %v1036_v57, %v820_v56  ;;  %873 = vst [vmem:[%s1574_s30 + $0x50] sm:$0xff] %v857_v48 }
 0x16c   : > { %874 = vst [vmem:[%s1574_s30 + $0x58] sm:$0xff] %v858_v38 }
 0x16d   : > { %867 = vst [vmem:[%s1574_s30 + $0x20] sm:$0xff] %v851_v1 }
 0x16e   : > { %868 = vst [vmem:[%s1574_s30 + $0x28] sm:$0xff] %v852_v7 }
 0x178   : > { %v830_v16 = vpop.permute.xlu1 %829 }
 0x179   : > { %v855_v9 = vmul.f32 %v1037_v27, %v830_v16  ;;  %v856_v42 = vmul.f32 %v1038_v6, %v830_v16 }
 0x17b   : > { %v845_v25 = vpop.permute.xlu2 %844  ;;  %871 = vst [vmem:[%s1574_s30 + $0x40] sm:$0xff] %v855_v9 }
 0x17c   : > { %v861_v46 = vmul.f32 %v1039_v60, %v845_v25  ;;  %v862_v35 = vmul.f32 %v1040_v61, %v845_v25  ;;  %872 = vst [vmem:[%s1574_s30 + $0x48] sm:$0xff] %v856_v42 }
 0x17e   : > { %877 = vst [vmem:[%s1574_s30 + $0x70] sm:$0xff] %v861_v46 }
 0x17f   : > { %878 = vst [vmem:[%s1574_s30 + $0x78] sm:$0xff] %v862_v35 }
 0x188   : > { %v840_v24 = vpop.permute.xlu1 %839 }
 0x189   : > { %v859_v11 = vmul.f32 %v1041_v52, %v840_v24  ;;  %v860_v17 = vmul.f32 %v1042_v4, %v840_v24 }
 0x18b   : > { %875 = vst [vmem:[%s1574_s30 + $0x60] sm:$0xff] %v859_v11 }
 0x18c   : > { %876 = vst [vmem:[%s1574_s30 + $0x68] sm:$0xff] %v860_v17 }
 0x18d PF: > { %s20_s13 = sadd.s32 1, %s1063_s13  }
 0x18e   : > { %p17_p4 = scmp.ge.s32.totalorder %s20_s13, 4  }
 0x190   :  { %19 = sbr.rel (!%p17_p4) target bundleno = 7 (0x7), region = 54 }

</bundles_post_ra>
